<compile_context>
chip_gen: v7x
topology: tpu7x:2x2x1
jax: 0.10.0
libtpu: 0.0.40
codegen_flags: <defaults>
</compile_context>

<pallas_src>
import jax
import jax.numpy as jnp
from jax.experimental import pallas as pl
from jax.experimental.pallas import tpu as pltpu


def _pow_kernel(x_ref, p_ref, o_ref):
    x = x_ref[...]
    p = p_ref[...]
    xc = jnp.maximum(x, 0.0)                 # clamp(min=0)
    pos = xc > 0.0                           # single mask reused for both selects
    safe = jnp.where(pos, xc, 1.0)           # avoid log(0) NaNs
    powed = jnp.exp(p * jnp.log(safe))       # xc ** p for xc > 0 (EUP exp/log)
    o_ref[...] = jnp.where(pos, powed, 0.0)  # zero where clamp(x) <= 0


_TINY_ELEMS = 64 * 1024            # <= this: single grid-less block (no pipelining win)
_FLAT_WIDTH = 1024                 # lane-dense width for the flattened fallback path
_FLAT_PAD_GRAN = 8 * _FLAT_WIDTH   # 8192-element pad granularity (32 KiB per array)


def _vmem_capacity_bytes():
    """Physical VMEM of the attached TPU; conservative 64 MiB (v7x) fallback."""
    try:
        return int(pltpu.get_tpu_info().vmem_capacity_bytes)
    except Exception:
        return 64 * 1024 * 1024


def _choose_tile_rows(rows, cols, vmem_bytes):
    """Row-tile targeting ~4 MiB/array (v7x) or ~8 MiB/array (v5e/v6e) while
    keeping >= ~4 grid steps for DMA overlap / v7x megacore sharding."""
    if vmem_bytes >= 96 * 1024 * 1024:       # v5e / v6e: 128 MiB physical VMEM
        target_bytes = 8 * 1024 * 1024
    else:                                     # v7x: 64 MiB physical VMEM
        target_bytes = 4 * 1024 * 1024
    tr = max(8, (target_bytes // (cols * 4)) // 8 * 8)
    tr = min(tr, max(8, (rows // 4) // 8 * 8))   # prefer >= 4 pipeline steps
    return min(tr, rows)


def _pow_2d(x2, p2, vmem_bytes):
    """Elementwise pow on an f32 (rows, cols) slab. Gridded path assumes
    rows % 8 == 0 and cols % 128 == 0; tiny path has no such constraint."""
    rows, cols = x2.shape
    n = rows * cols

    if n <= _TINY_ELEMS:
        # Truly small: whole slab resident in VMEM, single grid-less call.
        vspec = pl.BlockSpec(memory_space=pltpu.MemorySpace.VMEM)
        return pl.pallas_call(
            _pow_kernel,
            out_shape=jax.ShapeDtypeStruct((rows, cols), jnp.float32),
            in_specs=[vspec, vspec],
            out_specs=vspec,
        )(x2, p2)

    tile_rows = _choose_tile_rows(rows, cols, vmem_bytes)
    grid = (pl.cdiv(rows, tile_rows),)        # ragged last tile: OK (elementwise)
    spec = pl.BlockSpec((tile_rows, cols), lambda i: (i, 0))
    vmem_limit = (56 * 1024 * 1024 if vmem_bytes >= 96 * 1024 * 1024
                  else 32 * 1024 * 1024)

    return pl.pallas_call(
        _pow_kernel,
        out_shape=jax.ShapeDtypeStruct((rows, cols), jnp.float32),
        grid_spec=pltpu.PrefetchScalarGridSpec(
            num_scalar_prefetch=0,
            grid=grid,
            in_specs=[spec, spec],
            out_specs=spec,
        ),
        compiler_params=pltpu.CompilerParams(
            dimension_semantics=("parallel",),   # shards grid across v7x's 2 TCs
            vmem_limit_bytes=vmem_limit,
        ),
        cost_estimate=pl.CostEstimate(
            flops=6 * n, transcendentals=2 * n, bytes_accessed=12 * n),
    )(x2, p2)


def pow_forward(x, pow_param):
    """Elementwise clamp(x, min=0) ** pow, with 0 where clamp(x) <= 0."""
    assert x.shape == pow_param.shape
    orig_shape = x.shape
    n = x.size
    vmem_bytes = _vmem_capacity_bytes()

    x_f = x.astype(jnp.float32)
    p_f = pow_param.astype(jnp.float32)

    if x.ndim >= 2:
        cols = orig_shape[-1]
        lead = n // cols
        if cols % 128 == 0 and lead % 8 == 0:
            # Fast path: natural layout is already TPU-tileable. The reshape of
            # contiguous data is a bitcast -> no pad, no slice, no extra HBM
            # traffic in the wrapper.
            out = _pow_2d(x_f.reshape(lead, cols), p_f.reshape(lead, cols),
                          vmem_bytes)
            return out.reshape(orig_shape)
        if n <= _TINY_ELEMS and x.ndim == 2:
            # Tiny arbitrary 2-D shape: full-array block, no padding needed.
            return _pow_2d(x_f, p_f, vmem_bytes).reshape(orig_shape)

    # Fallback: flatten to a lane-dense (rows, 1024) slab with fine-grained
    # padding; skip pad/slice entirely when n is already aligned.
    x1 = jnp.ravel(x_f)
    p1 = jnp.ravel(p_f)
    n_pad = pl.cdiv(max(n, 1), _FLAT_PAD_GRAN) * _FLAT_PAD_GRAN
    pad = n_pad - n
    if pad:
        x1 = jnp.pad(x1, (0, pad))   # zeros -> output 0 -> sliced away below
        p1 = jnp.pad(p1, (0, pad))
    rows = n_pad // _FLAT_WIDTH
    out = _pow_2d(x1.reshape(rows, _FLAT_WIDTH),
                  p1.reshape(rows, _FLAT_WIDTH), vmem_bytes)
    if pad:
        out = out.reshape(-1)[:n]
    return out.reshape(orig_shape)


class PowModule:
    """Mirror of the PyTorch Pow(nn.Module): holds the `pow` parameter."""

    def __init__(self, in_x, in_y, key):
        self.in_x = in_x
        self.in_y = in_y
        # deterministic init equivalent to torch.randn(in_x, in_y)
        self.pow = jax.random.normal(key, (in_x, in_y), dtype=jnp.float32)

    def __call__(self, x):
        assert x.shape == (self.in_x, self.in_y)
        return pow_forward(x, self.pow)


def _reference(x, p):
    xc = jnp.maximum(x.astype(jnp.float32), 0.0)
    return jnp.where(xc > 0.0, jnp.power(xc, p.astype(jnp.float32)), 0.0
                     ).astype(jnp.float32)


if __name__ == "__main__":
    key = jax.random.PRNGKey(0)
    keys = jax.random.split(key, 6)

    # Case 1: module's small demo shape (8, 128) -> grid-less tiny path.
    in_x, in_y = 8, 128
    module = PowModule(in_x, in_y, keys[0])
    x = jax.random.normal(keys[1], (in_x, in_y), dtype=jnp.float32)
    out = jax.block_until_ready(module(x))
    ref = _reference(x, module.pow)
    assert out.shape == (in_x, in_y) and out.dtype == jnp.float32
    assert bool(jnp.allclose(out, ref, rtol=1e-5, atol=1e-5))

    # Case 2: larger aligned shape -> zero-pad fast path, gridded (>= 4 steps).
    bx, by = 768, 1024
    p_big = jax.random.normal(keys[2], (bx, by), dtype=jnp.float32)
    x_big = jax.random.normal(keys[3], (bx, by), dtype=jnp.float32)
    out_big = jax.block_until_ready(pow_forward(x_big, p_big))
    ref_big = _reference(x_big, p_big)
    assert out_big.shape == (bx, by) and out_big.dtype == jnp.float32
    assert bool(jnp.allclose(out_big, ref_big, rtol=1e-5, atol=1e-5))

    # Case 3: odd, unaligned shape -> flattened fallback path with fine pad.
    ox, oy = 37, 100
    p_odd = jax.random.normal(keys[4], (ox, oy), dtype=jnp.float32)
    x_odd = jax.random.normal(keys[5], (ox, oy), dtype=jnp.float32)
    out_odd = jax.block_until_ready(pow_forward(x_odd, p_odd))
    ref_odd = _reference(x_odd, p_odd)
    assert out_odd.shape == (ox, oy) and out_odd.dtype == jnp.float32
    assert bool(jnp.allclose(out_odd, ref_odd, rtol=1e-5, atol=1e-5))

    print("KERNEL_OK")
</pallas_src>

<mosaic_0001>
module attributes {stable_mosaic.version = 11 : i64} {
  func.func @_pow_kernel(%arg0: memref<8x128xf32, #tpu.memory_space<vmem>>, %arg1: memref<8x128xf32, #tpu.memory_space<vmem>>, %arg2: memref<8x128xf32, #tpu.memory_space<vmem>>) attributes {dimension_semantics = [], scalar_prefetch = 0 : i64, scratch_operands = 0 : i64, tpu.core_type = #tpu.core_type<tc>} {
    %c0 = arith.constant 0 : index
    %c0_0 = arith.constant 0 : index
    %0 = vector.load %arg0[%c0, %c0_0] : memref<8x128xf32, #tpu.memory_space<vmem>>, vector<8x128xf32>
    %c0_1 = arith.constant 0 : index
    %c0_2 = arith.constant 0 : index
    %1 = vector.load %arg1[%c0_1, %c0_2] : memref<8x128xf32, #tpu.memory_space<vmem>>, vector<8x128xf32>
    %cst = arith.constant 0.000000e+00 : f32
    %2 = vector.broadcast %cst : f32 to vector<8x128xf32>
    %3 = arith.maximumf %0, %2 : vector<8x128xf32>
    %cst_3 = arith.constant 0.000000e+00 : f32
    %4 = vector.broadcast %cst_3 : f32 to vector<8x128xf32>
    %5 = arith.cmpf ogt, %3, %4 : vector<8x128xf32>
    %cst_4 = arith.constant 1.000000e+00 : f32
    %6 = vector.broadcast %cst_4 : f32 to vector<8x128xf32>
    %7 = arith.select %5, %3, %6 : vector<8x128xi1>, vector<8x128xf32>
    %8 = math.log %7 : vector<8x128xf32>
    %9 = arith.mulf %1, %8 : vector<8x128xf32>
    %10 = math.exp %9 : vector<8x128xf32>
    %cst_5 = arith.constant 0.000000e+00 : f32
    %11 = vector.broadcast %cst_5 : f32 to vector<8x128xf32>
    %12 = arith.select %5, %10, %11 : vector<8x128xi1>, vector<8x128xf32>
    %c0_6 = arith.constant 0 : index
    %c0_7 = arith.constant 0 : index
    %13 = vector.load %arg2[%c0_6, %c0_7] : memref<8x128xf32, #tpu.memory_space<vmem>>, vector<8x128xf32>
    tpu.vector_store %arg2[%c0_6, %c0_7], %12 {strides = array<i32>} : memref<8x128xf32, #tpu.memory_space<vmem>>, vector<8x128xf32>,
    return
  }
}

</mosaic_0001>

<bundles_post_ra>
// kernel: tpu_custom_call.1
= control target key start
LH: loop header
LB: loop body
LE: loop exit
PB: predicated region body
PF: predicated region fallthrough
CT: control target
= control target key end

     0   :  { %7 = vsyncpa [#allocation3], 0  ;;  %s197_s0 = inlined_call_operand.hbm [shape: f32[8,128], index: 0, kind: input, shape index: {}]   ;;  %s198_s1 = inlined_call_operand.hbm [shape: f32[8,128], index: 1, kind: input, shape index: {}]   ;;  %s199_s2 = inlined_call_operand.hbm [shape: f32[8,128], index: 2, kind: output, shape index: {}]  }
   0x1   :  { %8 = vsyncpa [#allocation6], 0 }
   0x2   :  { %9 = vsyncpa [#allocation4], 0  ;;  %s143_s9 = smov [#allocation2]   ;;  %s144_s11 = smov [#allocation5]  }
   0x3   :  { %s16_s10 = sshll.u32 %s143_s9, 4  ;;  %s26_s12 = sshll.u32 %s144_s11, 4  ;;  %s17_s10 = int_to_ptr.vmem [resolvable:$true] %s16_s10  ;;  %s27_s12 = int_to_ptr.vmem [resolvable:$true] %s26_s12 }
   0x4   :  { %s71_s15 = scalar_lea.hbm %s197_s0, 128 }
   0x5   :  { %p72_p0 = scmp.ne.s32.totalorder %s197_s0, %s71_s15  ;;  %p75_p1 = scmp.lt.u32.totalorder %s71_s15, %s197_s0 }
   0x7   :  { %p77_p2 = pnand %p75_p1, %p72_p0 }
   0x9   :  { %80 = shalt.err (!%p77_p2)
}
   0xa   :  { %s81_s20 = scalar_lea.vmem %s17_s10, 128  ;;  %p86_p4 = scmp.lt.s32.totalorder %s17_s10, %s17_s10 }
   0xb   :  { %p82_p3 = scmp.ne.s32.totalorder %s17_s10, %s81_s20  ;;  %p87_p5 = scmp.lt.s32.totalorder %s81_s20, %s81_s20 }
   0xd   :  { %p88_p6 = por %p87_p5, %p86_p4 }
   0xf   :  { %p89_p7 = pnand %p88_p6, %p82_p3 }
  0x11   :  { %92 = shalt.err (!%p89_p7)
}
  0x12   :  { %19 = dma.hbm_to_vmem [thread:$0]  %s197_s0, 128, %s17_s10, [#allocation3]  }
  0x13   :  { %s93_s25 = scalar_lea.hbm %s198_s1, 128 }
  0x14   :  { %p94_p8 = scmp.ne.s32.totalorder %s198_s1, %s93_s25  ;;  %p97_p9 = scmp.lt.u32.totalorder %s93_s25, %s198_s1 }
  0x16   :  { %p99_p10 = pnand %p97_p9, %p94_p8 }
  0x18   :  { %102 = shalt.err (!%p99_p10)
}
  0x19   :  { %s103_s30 = scalar_lea.vmem %s27_s12, 128  ;;  %p108_p12 = scmp.lt.s32.totalorder %s27_s12, %s27_s12 }
  0x1a   :  { %p104_p11 = scmp.ne.s32.totalorder %s27_s12, %s103_s30  ;;  %p109_p13 = scmp.lt.s32.totalorder %s103_s30, %s103_s30 }
  0x1c   :  { %p110_p0 = por %p109_p13, %p108_p12 }
  0x1e   :  { %p111_p1 = pnand %p110_p0, %p104_p11 }
  0x20   :  { %114 = shalt.err (!%p111_p1)
}
  0x21   :  { %29 = dma.hbm_to_vmem [thread:$0]  %s198_s1, 128, %s27_s12, [#allocation6]  }
  0x22   :  { %137 = dma.done.wait [#allocation3], 128  }
  0x23   :  { %138 = vsyncadd [#allocation3], 4294967168 }
  0x24   :  { %139 = dma.done.wait [#allocation6], 128  }
  0x25   :  { %140 = vsyncadd [#allocation6], 4294967168  ;;  %v36_v0 = vld [vmem:[#allocation2] sm:$0xff]  ;;  %v37_v4 = vld [vmem:[#allocation5] sm:$0xff]  ;;  %s145_s4 = smov [#allocation7]  }
  0x26   :  { %v38_v1 = vmax.f32 %v36_v0, 0.0  ;;  %s54_s5 = sshll.u32 %s145_s4, 4  ;;  %s55_s5 = int_to_ptr.vmem [resolvable:$true] %s54_s5 }
  0x27   :  { %s115_s1 = scalar_lea.vmem %s55_s5, 128  ;;  %p120_p3 = scmp.lt.s32.totalorder %s55_s5, %s55_s5 }
  0x28   :  { %vm39_vm0 = vcmp.gt.f32.partialorder %v38_v1, 0.0  ;;  %p116_p2 = scmp.ne.s32.totalorder %s55_s5, %s115_s1  ;;  %p121_p4 = scmp.lt.s32.totalorder %s115_s1, %s115_s1 }
  0x29   :  { %v40_v2 = vsel %vm39_vm0, %v38_v1, 1.0 }
  0x2a   :  { %67 = vlog2.f32 %v40_v2  ;;  %p122_p5 = por %p121_p4, %p120_p3 }
  0x2c   :  { %p123_p6 = pnand %p122_p5, %p116_p2 }
  0x34   :  { %v68_v3 = vpop.eup %67 }
  0x35   :  { %v42_v5 = vmul.f32 0.6931472, %v68_v3 }
  0x37   :  { %v43_v6 = vmul.f32 %v42_v5, %v37_v4 }
  0x39   :  { %v44_v7 = vmul.f32 1.442695, %v43_v6 }
  0x3b   :  { %69 = vpow2.f32 %v44_v7 }
  0x45   :  { %v70_v8 = vpop.eup %69 }
  0x46   :  { %v46_v9 = vsel %vm39_vm0, %v70_v8, 0.0 }
  0x47   :  { %47 = vst [vmem:[#allocation7] sm:$0xff] %v46_v9 }
  0x48   :  { %126 = shalt.err (!%p123_p6)
}
  0x49   :  { %s127_s8 = scalar_lea.hbm %s199_s2, 128 }
  0x4a   :  { %p128_p7 = scmp.ne.s32.totalorder %s199_s2, %s127_s8  ;;  %p131_p8 = scmp.lt.u32.totalorder %s127_s8, %s199_s2 }
  0x4c   :  { %p133_p9 = pnand %p131_p8, %p128_p7 }
  0x4e   :  { %136 = shalt.err (!%p133_p9)
}
  0x4f   :  { %57 = dma.vmem_to_hbm [thread:$0]  %s55_s5, 128, %s199_s2, [#allocation4]  }
  0x50   :  { %141 = dma.done.wait [#allocation4], 128  }
  0x51   :  { %142 = vsyncadd [#allocation4], 4294967168 }
  0x52   :  { %61 = vsyncpa [#allocation3], 1 }
  0x53   :  { %62 = vsyncpa [#allocation6], 1 }
  0x54   :  { %63 = vsyncpa [#allocation4], 1 }

</bundles_post_ra>
